<compile_context>
chip_gen: v6e
topology: v6e:2x2x1
jax: 0.10.0
libtpu: 0.0.40
codegen_flags: <defaults>
</compile_context>

<pallas_src>
import functools

import jax
import jax.numpy as jnp
from jax.experimental import pallas as pl
from jax.experimental.pallas import tpu as pltpu


def _cdiv(a, b):
    return -(-a // b)


def _round_up(a, b):
    return _cdiv(a, b) * b


def _min_value(dtype):
    if jnp.issubdtype(dtype, jnp.floating):
        return jnp.finfo(dtype).min
    if jnp.issubdtype(dtype, jnp.integer):
        return jnp.iinfo(dtype).min
    return False  # bool


def _pick_tile_bytes():
    """Per-input-tile byte budget, derived from the local chip's VMEM."""
    try:
        cap = int(pltpu.get_tpu_info().vmem_capacity_bytes)
    except Exception:  # no TPU info available — be conservative (v7x per-core VMEM)
        cap = 64 * 1024 * 1024
    # Double-buffered input (2x tile) + output + slack stays well under
    # physical VMEM everywhere: ~34 MiB on v5e/v6e (128 MiB physical),
    # ~28 MiB on v7x (64 MiB physical).
    return int(max(2 * 1024 * 1024, min(16 * 1024 * 1024, cap // 5)))


def _plan(rows, cols, itemsize, sub, tile_bytes):
    """Choose (tile_rows, tile_cols).  tile_cols == cols means no column tiling."""
    cols_phys = _round_up(cols, 128)  # lane-padded width of the VMEM buffer
    tr_fit = tile_bytes // (cols_phys * itemsize)  # rows that fit with full-width cols

    if tr_fit >= sub:
        # Common case: keep the full spatial extent per tile, tile only the rows.
        tr_max = (tr_fit // sub) * sub
        n_rt = _cdiv(_round_up(rows, sub), tr_max)
        if rows >= 2 * sub:
            n_rt = max(2, n_rt)   # >=2 row tiles: pipelining + both v7x TCs busy
            n_rt += n_rt % 2      # even count for TensorCore balance
        if n_rt <= 1:
            return rows, cols     # single full-height block (block == full dim)
        tile_rows = _round_up(_cdiv(rows, n_rt), sub)
        if tile_rows >= rows:
            tile_rows = rows
        return tile_rows, cols

    # Very large spatial maps: tile both axes (column axis is the reduction).
    max_tr = min(_round_up(rows, sub), 256)
    n_rt = _cdiv(rows, max_tr)
    if rows >= 2 * sub:
        n_rt = max(2, n_rt)
        n_rt += n_rt % 2
    if n_rt <= 1:
        tile_rows = rows
    else:
        tile_rows = _round_up(_cdiv(rows, n_rt), sub)
        if tile_rows >= rows:
            tile_rows = rows
    tr_phys = _round_up(tile_rows, sub)
    tile_cols = max(128, (tile_bytes // (tr_phys * itemsize)) // 128 * 128)
    tile_cols = min(tile_cols, cols)
    return tile_rows, tile_cols


def _mac_kernel_1d(x_ref, o_ref):
    # Single column tile: one lane-axis reduce, unconditional store.  Garbage
    # rows of a partial last row tile produce garbage outputs that Pallas never
    # writes back (clamped partial-block write).
    o_ref[...] = jnp.max(x_ref[...], axis=-1, keepdims=True)


def _mac_kernel_2d(x_ref, o_ref, *, rem, min_val):
    # Column-tiled path: k (last grid axis) is the reduction; o_ref's block is
    # resident across k and holds the running max.
    k = pl.program_id(1)
    nk = pl.num_programs(1)
    x = x_ref[...]
    if rem:
        # The partial last column tile's out-of-bounds lanes hold undefined
        # VMEM data — mask them with the dtype minimum.  For non-last tiles the
        # limit equals the tile width, so the select is a no-op (cheap VPU op,
        # fully hidden under the DMA).
        limit = jnp.where(k == nk - 1, rem, x.shape[-1])
        col = jax.lax.broadcasted_iota(jnp.int32, x.shape, dimension=1)
        x = jnp.where(col < limit, x, jnp.asarray(min_val, dtype=x.dtype))
    tile_max = jnp.max(x, axis=-1, keepdims=True)

    @pl.when(k == 0)
    def _init():
        o_ref[...] = tile_max

    @pl.when(k > 0)
    def _accum():
        o_ref[...] = jnp.maximum(o_ref[...], tile_max)


def mac(x: jax.Array, *, tile_bytes: int | None = None) -> jax.Array:
    """Global spatial max pooling, equivalent to LF.mac(x) / MAC().forward(x).

    x: (N, C, H, W)  ->  (N, C, 1, 1)
    """
    N, C, H, W = x.shape
    rows, cols = N * C, H * W
    dtype = x.dtype

    # Tiny spatial maps (< one lane of reduction) or degenerate shapes: XLA's
    # reduce is already at roofline, skip Pallas.
    if rows == 0 or cols < 128:
        return jnp.max(x, axis=(2, 3), keepdims=True)

    itemsize = jnp.dtype(dtype).itemsize
    sub = max(8, 32 // itemsize)  # dtype-aware sublane multiple: 8 f32, 16 bf16, 32 int8
    if tile_bytes is None:
        tile_bytes = _pick_tile_bytes()

    tile_rows, tile_cols = _plan(rows, cols, itemsize, sub, tile_bytes)

    n_rt = _cdiv(rows, tile_rows)
    n_kt = _cdiv(cols, tile_cols)

    # Physical (padded) footprint for the explicit VMEM limit.
    tr_phys = _round_up(tile_rows, sub)
    tc_phys = _round_up(tile_cols, 128)
    in_tile_bytes = tr_phys * tc_phys * itemsize
    out_tile_bytes = tr_phys * 128 * itemsize
    vmem_limit = int(2 * (in_tile_bytes + out_tile_bytes) + (2 << 20))

    cost = pl.CostEstimate(
        flops=rows * cols,
        transcendentals=0,
        bytes_accessed=rows * cols * itemsize + rows * itemsize,
    )

    if n_kt == 1:
        kernel = _mac_kernel_1d
        grid = (n_rt,)
        in_specs = [pl.BlockSpec((tile_rows, cols), lambda i: (i, 0))]
        out_specs = pl.BlockSpec((tile_rows, 1), lambda i: (i, 0))
        dims = ("parallel",)
    else:
        rem = cols % tile_cols
        kernel = functools.partial(_mac_kernel_2d, rem=rem, min_val=_min_value(dtype))
        grid = (n_rt, n_kt)  # reduction axis last
        in_specs = [pl.BlockSpec((tile_rows, tile_cols), lambda i, k: (i, k))]
        out_specs = pl.BlockSpec((tile_rows, 1), lambda i, k: (i, 0))
        dims = ("parallel", "arbitrary")

    x2d = x.reshape(rows, cols)

    out2d = pl.pallas_call(
        kernel,
        out_shape=jax.ShapeDtypeStruct((rows, 1), dtype),
        grid_spec=pltpu.PrefetchScalarGridSpec(
            num_scalar_prefetch=0,
            grid=grid,
            in_specs=in_specs,
            out_specs=out_specs,
        ),
        compiler_params=pltpu.CompilerParams(
            dimension_semantics=dims,
            vmem_limit_bytes=vmem_limit,
        ),
        cost_estimate=cost,
    )(x2d)

    return out2d.reshape(N, C, 1, 1)


if __name__ == "__main__":
    key = jax.random.PRNGKey(0)

    # Small NCHW input consistent with MAC's expected conv feature-map input.
    x = jax.random.normal(key, (2, 4, 16, 16), dtype=jnp.float32)
    out = mac(x)
    jax.block_until_ready(out)
    ref = jnp.max(x, axis=(2, 3), keepdims=True)
    assert out.shape == (2, 4, 1, 1), out.shape
    assert jnp.allclose(out, ref), "mismatch vs reference (f32 small)"

    # Multi-row-tile path (rows split into >=2 parallel tiles, no padding).
    x2 = jax.random.normal(jax.random.PRNGKey(1), (4, 96, 32, 32), dtype=jnp.float32)
    o2 = mac(x2)
    jax.block_until_ready(o2)
    assert jnp.allclose(o2, jnp.max(x2, axis=(2, 3), keepdims=True)), "mismatch (row tiles)"

    # Large spatial extent with few rows (row-tiled, full-width columns).
    x3 = jax.random.normal(jax.random.PRNGKey(2), (1, 16, 320, 320), dtype=jnp.float32)
    o3 = mac(x3)
    jax.block_until_ready(o3)
    assert jnp.allclose(o3, jnp.max(x3, axis=(2, 3), keepdims=True)), "mismatch (large spatial)"

    # Force the column-tiled running-max path with a partial, masked last
    # column tile (deterministic regardless of device generation).
    x4 = jax.random.normal(jax.random.PRNGKey(3), (1, 4, 40, 40), dtype=jnp.float32)
    o4 = mac(x4, tile_bytes=32 * 1024)
    jax.block_until_ready(o4)
    assert jnp.allclose(o4, jnp.max(x4, axis=(2, 3), keepdims=True)), "mismatch (masked col tiles)"

    # bf16 (sublane multiple 16).
    x5 = jax.random.normal(jax.random.PRNGKey(4), (2, 4, 16, 16), dtype=jnp.bfloat16)
    o5 = mac(x5)
    jax.block_until_ready(o5)
    assert jnp.array_equal(o5, jnp.max(x5, axis=(2, 3), keepdims=True)), "mismatch (bf16)"

    print("KERNEL_OK")
</pallas_src>

<mosaic_0001>
module attributes {stable_mosaic.version = 11 : i64} {
  func.func @_mac_kernel_1d(%arg0: i32, %arg1: memref<8x256xf32, #tpu.memory_space<vmem>>, %arg2: memref<8x1xf32, #tpu.memory_space<vmem>>) attributes {dimension_semantics = [#tpu.dimension_semantics<parallel>], iteration_bounds = array<i64: 1>, scalar_prefetch = 0 : i64, scratch_operands = 0 : i64, tpu.core_type = #tpu.core_type<tc>, window_params = [{transform_indices = @transform_0, window_bounds = array<i64: 8, 256>}, {transform_indices = @transform_1, window_bounds = array<i64: 8, 1>}]} {
    %c0 = arith.constant 0 : index
    %c0_0 = arith.constant 0 : index
    %0 = vector.load %arg1[%c0, %c0_0] : memref<8x256xf32, #tpu.memory_space<vmem>>, vector<8x256xf32>
    %cst = arith.constant dense<0xFF800000> : vector<8xf32>
    %1 = vector.multi_reduction <maximumf>, %0, %cst [1] : vector<8x256xf32> to vector<8xf32>
    %2 = vector.shape_cast %1 : vector<8xf32> to vector<8x1xf32>
    %c0_1 = arith.constant 0 : index
    %c0_2 = arith.constant 0 : index
    %3 = vector.load %arg2[%c0_1, %c0_2] : memref<8x1xf32, #tpu.memory_space<vmem>>, vector<8x1xf32>
    tpu.vector_store %arg2[%c0_1, %c0_2], %2 {strides = array<i32>} : memref<8x1xf32, #tpu.memory_space<vmem>>, vector<8x1xf32>,
    return
  }
  func.func @transform_0(%arg0: i32) -> (i32, i32) {
    %c0_i32 = arith.constant 0 : i32
    %c0_i32_0 = arith.constant 0 : i32
    return %arg0, %c0_i32 : i32, i32
  }
  func.func @transform_1(%arg0: i32) -> (i32, i32) {
    %c0_i32 = arith.constant 0 : i32
    %c0_i32_0 = arith.constant 0 : i32
    return %arg0, %c0_i32 : i32, i32
  }
}

</mosaic_0001>

<bundles_post_ra>
// kernel: tpu_custom_call.1
= control target key start
LH: loop header
LB: loop body
LE: loop exit
PB: predicated region body
PF: predicated region fallthrough
CT: control target
= control target key end

     0   :  { %6 = vsyncpa [#allocation3], 0  ;;  %s55_s6 = smov [#allocation2]   ;;  %s72_s0 = inlined_call_operand.hbm [shape: f32[8,256], index: 0, kind: input, shape index: {}]   ;;  %s73_s1 = inlined_call_operand.vmem [shape: f32[8,1], index: 1, kind: output, shape index: {}]  }
   0x1   :  { %s13_s7 = sshll.u32 %s55_s6, 4  ;;  %s14_s7 = int_to_ptr.vmem [resolvable:$true] %s13_s7 }
   0x2   :  { %s41_s8 = scalar_lea.vmem %s14_s7, 256  ;;  %p46_p1 = scmp.lt.s32.totalorder %s14_s7, %s14_s7 }
   0x3   :  { %p42_p0 = scmp.ne.s32.totalorder %s14_s7, %s41_s8  ;;  %p47_p2 = scmp.lt.s32.totalorder %s41_s8, %s41_s8 }
   0x5   :  { %p48_p3 = por %p47_p2, %p46_p1 }
   0x7   :  { %p49_p4 = pnand %p48_p3, %p42_p0 }
   0x9   :  { %52 = shalt.err (!%p49_p4)
}
   0xa   :  { %16 = dma.hbm_to_vmem [thread:$0]  %s72_s0, 256, %s14_s7, [#allocation3]  }
   0xb   :  { %53 = dma.done.wait [#allocation3], 256  }
   0xc   :  { %54 = vsyncadd [#allocation3], 4294967040  ;;  %v20_v0 = vld [vmem:[#allocation2] sm:$0xff]  ;;  %v21_v1 = vld [vmem:[#allocation2 + $0x8] sm:$0xff]  ;;  %vm25_vm0 = vcmask 7168  }
   0xd   :  { %v22_v2 = vmax.f32 %v20_v0, %v21_v1 }
   0xf   :  { %23 = vmax.xlane.f32.xlu0 %v22_v2 }
  0x98   :  { %v24_v3 = vpop.xlane.xlu0 %23 }
  0x99   :  { %26 = vst.msk [vmem:[%s73_s1] sm:$0xff] %vm25_vm0, %v24_v3 }
  0x9a   :  { %31 = vsyncpa [#allocation3], 1 }

</bundles_post_ra>
